<compile_context>
chip_gen: v6e
topology: v6e:2x2x1
jax: 0.10.0
libtpu: 0.0.40
codegen_flags: <defaults>
</compile_context>

<pallas_src>
import math

import jax
import jax.numpy as jnp
from jax import lax
from jax.experimental import pallas as pl
from jax.experimental.pallas import tpu as pltpu


def _round_up(n, m):
    return (n + m - 1) // m * m


def _make_mlp_kernel(num_layers, out_valid):
    """Kernel for `num_layers` Linear layers (last one is the output head).

    Ref order: x_ref, (w_ref, b_ref) * num_layers, out_ref.
    Weights are (in_p, out_p) bfloat16; biases are (1, out_p) float32.
    """
    def kernel(*refs):
        x_ref = refs[0]
        out_ref = refs[-1]
        h = x_ref[...].astype(jnp.float32)                        # (bm, in_p) f32
        for i in range(num_layers):
            w = refs[1 + 2 * i][...]                              # bf16 (in_p, out_p)
            b = refs[2 + 2 * i][...]                              # f32  (1, out_p)
            # bf16 MXU matmul with f32 accumulation.
            y = jnp.dot(h.astype(jnp.bfloat16), w,
                        preferred_element_type=jnp.float32) + b
            if i < num_layers - 1:
                h = jnp.maximum(y, 0.0)                           # ReLU
                # TODO(synk): dropout is identity here (eval-mode semantics);
                # training-mode dropout needs pltpu.prng_seed/prng_random_bits
                # Bernoulli masking with 1/(1-p) scaling.
            else:
                # log_softmax over the valid lanes only; padded lanes -> -inf so
                # they cannot corrupt the max / normalizer.
                valid = lax.broadcasted_iota(jnp.int32, y.shape, 1) < out_valid
                y_m = jnp.where(valid, y, -jnp.inf)
                m = jnp.max(y_m, axis=1, keepdims=True)
                lse = jnp.log(jnp.sum(jnp.exp(y_m - m), axis=1, keepdims=True)) + m
                h = jnp.where(valid, y - lse, 0.0)
        out_ref[...] = h
    return kernel


def prepare_params(params, weight_dtype=jnp.bfloat16):
    """Pad + transpose + cast nn.Linear-style params once (done at build time).

    params: list of (W (out,in) f32, b (out,) f32) like nn.Linear.
    Returns (flat tuple of padded arrays, list of (in, out, in_p, out_p)).
    """
    flat, dims = [], []
    for w, b in params:
        out_f, in_f = w.shape
        in_p, out_p = _round_up(in_f, 128), _round_up(out_f, 128)
        wt = jnp.asarray(w, jnp.float32).T.astype(weight_dtype)        # (in, out)
        wp = jnp.zeros((in_p, out_p), weight_dtype).at[:in_f, :out_f].set(wt)
        bp = jnp.zeros((1, out_p), jnp.float32).at[0, :out_f].set(
            jnp.asarray(b, jnp.float32))
        flat += [wp, bp]
        dims.append((in_f, out_f, in_p, out_p))
    return tuple(flat), dims


def build_classifier(params, *, bm_max=128):
    """Returns (jitted forward(x, flat_params), flat_params)."""
    flat_params, dims = prepare_params(params)
    num_layers = len(dims)
    in_valid, in_p = dims[0][0], dims[0][2]
    out_valid, out_p = dims[-1][1], dims[-1][3]
    kernel = _make_mlp_kernel(num_layers, out_valid)

    @jax.jit
    def forward(x, flat):
        B = x.shape[0]
        x2d = x.reshape(B, -1).astype(jnp.float32)       # == x.view(B, -1)
        assert x2d.shape[1] == in_valid, "input feature size mismatch"
        bm = bm_max if B >= bm_max else _round_up(B, 8)  # sublane-aligned batch tile
        B_pad = _round_up(B, bm)
        xp = jnp.pad(x2d, ((0, B_pad - B), (0, in_p - in_valid)))

        in_specs = [pl.BlockSpec((bm, in_p), lambda i: (i, 0))]
        for (_, _, ip, op) in dims:
            # constant index_map -> weights/biases stay resident across grid steps
            in_specs.append(pl.BlockSpec((ip, op), lambda i: (0, 0)))
            in_specs.append(pl.BlockSpec((1, op), lambda i: (0, 0)))

        out = pl.pallas_call(
            kernel,
            out_shape=jax.ShapeDtypeStruct((B_pad, out_p), jnp.float32),
            grid=(B_pad // bm,),
            in_specs=in_specs,
            out_specs=pl.BlockSpec((bm, out_p), lambda i: (i, 0)),
            compiler_params=pltpu.CompilerParams(
                dimension_semantics=("parallel",)),   # shards batch tiles across TCs
        )(xp, *flat)
        return out[:B, :out_valid]

    return forward, flat_params


def init_linear(key, in_features, out_features):
    """Deterministic init mimicking nn.Linear default (uniform +/- 1/sqrt(fan_in))."""
    kw, kb = jax.random.split(key)
    bound = 1.0 / math.sqrt(in_features)
    w = jax.random.uniform(kw, (out_features, in_features), jnp.float32, -bound, bound)
    b = jax.random.uniform(kb, (out_features,), jnp.float32, -bound, bound)
    return w, b


def init_classifier_params(key, input_w, output_w, hidden_layers):
    sizes = [input_w] + list(hidden_layers) + [output_w]
    params = []
    for i in range(len(sizes) - 1):
        key, sub = jax.random.split(key)
        params.append(init_linear(sub, sizes[i], sizes[i + 1]))
    return params


def reference_forward(x, params):
    """Pure-JAX f32 reference matching the PyTorch module (eval mode)."""
    h = x.reshape(x.shape[0], -1).astype(jnp.float32)
    for i, (w, b) in enumerate(params):
        y = h @ jnp.asarray(w, jnp.float32).T + jnp.asarray(b, jnp.float32)
        if i < len(params) - 1:
            h = jnp.maximum(y, 0.0)
        else:
            h = jax.nn.log_softmax(y, axis=1)
    return h


if __name__ == "__main__":
    # Small shapes consistent with the module's forward:
    # x: (B=2, C=4, H=16, W=16)  ->  input_w = 4*16*16 = 1024
    B, C, H, W = 2, 4, 16, 16
    input_w = C * H * W
    hidden_layers = [128, 64]
    output_w = 10

    key = jax.random.PRNGKey(0)
    kx, kp = jax.random.split(key)
    x = jax.random.normal(kx, (B, C, H, W), jnp.float32)
    params = init_classifier_params(kp, input_w, output_w, hidden_layers)

    forward, flat_params = build_classifier(params)
    out = forward(x, flat_params)
    out = jax.block_until_ready(out)

    # Sanity checks: shape, log_softmax rows sum to 1 in prob space, and
    # agreement with a pure-JAX f32 reference (loose tol due to bf16 weights).
    assert out.shape == (B, output_w)
    row_sums = jnp.exp(out).sum(axis=1)
    assert bool(jnp.allclose(row_sums, 1.0, atol=1e-4))
    ref = reference_forward(x, params)
    assert bool(jnp.allclose(out, ref, atol=5e-2))

    print("KERNEL_OK")
</pallas_src>

<mosaic_0001>
module attributes {stable_mosaic.version = 11 : i64} {
  func.func @kernel(%arg0: i32, %arg1: memref<8x1024xf32, #tpu.memory_space<vmem>>, %arg2: memref<1024x128xbf16, #tpu.memory_space<vmem>>, %arg3: memref<1x128xf32, #tpu.memory_space<vmem>>, %arg4: memref<128x128xbf16, #tpu.memory_space<vmem>>, %arg5: memref<1x128xf32, #tpu.memory_space<vmem>>, %arg6: memref<128x128xbf16, #tpu.memory_space<vmem>>, %arg7: memref<1x128xf32, #tpu.memory_space<vmem>>, %arg8: memref<8x128xf32, #tpu.memory_space<vmem>>) attributes {dimension_semantics = [#tpu.dimension_semantics<parallel>], iteration_bounds = array<i64: 1>, scalar_prefetch = 0 : i64, scratch_operands = 0 : i64, tpu.core_type = #tpu.core_type<tc>, window_params = [{transform_indices = @transform_0, window_bounds = array<i64: 8, 1024>}, {pipeline_mode = #tpu.pipeline_mode<synchronous>, transform_indices = @transform_1, window_bounds = array<i64: 1024, 128>}, {pipeline_mode = #tpu.pipeline_mode<synchronous>, transform_indices = @transform_2, window_bounds = array<i64: 1, 128>}, {pipeline_mode = #tpu.pipeline_mode<synchronous>, transform_indices = @transform_3, window_bounds = array<i64: 128, 128>}, {pipeline_mode = #tpu.pipeline_mode<synchronous>, transform_indices = @transform_4, window_bounds = array<i64: 1, 128>}, {pipeline_mode = #tpu.pipeline_mode<synchronous>, transform_indices = @transform_5, window_bounds = array<i64: 128, 128>}, {pipeline_mode = #tpu.pipeline_mode<synchronous>, transform_indices = @transform_6, window_bounds = array<i64: 1, 128>}, {transform_indices = @transform_7, window_bounds = array<i64: 8, 128>}]} {
    %c0 = arith.constant 0 : index
    %c0_0 = arith.constant 0 : index
    %0 = vector.load %arg1[%c0, %c0_0] : memref<8x1024xf32, #tpu.memory_space<vmem>>, vector<8x1024xf32>
    %c0_1 = arith.constant 0 : index
    %c0_2 = arith.constant 0 : index
    %1 = vector.load %arg2[%c0_1, %c0_2] : memref<1024x128xbf16, #tpu.memory_space<vmem>>, vector<1024x128xbf16>
    %c0_3 = arith.constant 0 : index
    %c0_4 = arith.constant 0 : index
    %2 = vector.load %arg3[%c0_3, %c0_4] : memref<1x128xf32, #tpu.memory_space<vmem>>, vector<1x128xf32>
    %3 = arith.truncf %0 : vector<8x1024xf32> to vector<8x1024xbf16>
    %cst = arith.constant dense<0.000000e+00> : vector<8x128xf32>
    %4 = tpu.matmul %3, %1, %cst {dimension_numbers = #tpu.dot_dimension_numbers<[1], [0], [0], [1], [0, 0, 1, 1], [], []>} : vector<8x1024xbf16>, vector<1024x128xbf16>, vector<8x128xf32> -> vector<8x128xf32>
    %5 = vector.broadcast %2 : vector<1x128xf32> to vector<8x128xf32>
    %6 = arith.addf %4, %5 : vector<8x128xf32>
    %cst_5 = arith.constant 0.000000e+00 : f32
    %7 = vector.broadcast %cst_5 : f32 to vector<8x128xf32>
    %8 = arith.maximumf %6, %7 : vector<8x128xf32>
    %c0_6 = arith.constant 0 : index
    %c0_7 = arith.constant 0 : index
    %9 = vector.load %arg4[%c0_6, %c0_7] : memref<128x128xbf16, #tpu.memory_space<vmem>>, vector<128x128xbf16>
    %c0_8 = arith.constant 0 : index
    %c0_9 = arith.constant 0 : index
    %10 = vector.load %arg5[%c0_8, %c0_9] : memref<1x128xf32, #tpu.memory_space<vmem>>, vector<1x128xf32>
    %11 = arith.truncf %8 : vector<8x128xf32> to vector<8x128xbf16>
    %cst_10 = arith.constant dense<0.000000e+00> : vector<8x128xf32>
    %12 = tpu.matmul %11, %9, %cst_10 {dimension_numbers = #tpu.dot_dimension_numbers<[1], [0], [0], [1], [0, 0, 1, 1], [], []>} : vector<8x128xbf16>, vector<128x128xbf16>, vector<8x128xf32> -> vector<8x128xf32>
    %13 = vector.broadcast %10 : vector<1x128xf32> to vector<8x128xf32>
    %14 = arith.addf %12, %13 : vector<8x128xf32>
    %cst_11 = arith.constant 0.000000e+00 : f32
    %15 = vector.broadcast %cst_11 : f32 to vector<8x128xf32>
    %16 = arith.maximumf %14, %15 : vector<8x128xf32>
    %c0_12 = arith.constant 0 : index
    %c0_13 = arith.constant 0 : index
    %17 = vector.load %arg6[%c0_12, %c0_13] : memref<128x128xbf16, #tpu.memory_space<vmem>>, vector<128x128xbf16>
    %c0_14 = arith.constant 0 : index
    %c0_15 = arith.constant 0 : index
    %18 = vector.load %arg7[%c0_14, %c0_15] : memref<1x128xf32, #tpu.memory_space<vmem>>, vector<1x128xf32>
    %19 = arith.truncf %16 : vector<8x128xf32> to vector<8x128xbf16>
    %cst_16 = arith.constant dense<0.000000e+00> : vector<8x128xf32>
    %20 = tpu.matmul %19, %17, %cst_16 {dimension_numbers = #tpu.dot_dimension_numbers<[1], [0], [0], [1], [0, 0, 1, 1], [], []>} : vector<8x128xbf16>, vector<128x128xbf16>, vector<8x128xf32> -> vector<8x128xf32>
    %21 = vector.broadcast %18 : vector<1x128xf32> to vector<8x128xf32>
    %22 = arith.addf %20, %21 : vector<8x128xf32>
    %23 = tpu.iota {dimensions = array<i32: 1>} : vector<8x128xi32>
    %c10_i32 = arith.constant 10 : i32
    %24 = vector.broadcast %c10_i32 : i32 to vector<8x128xi32>
    %25 = arith.cmpi slt, %23, %24 : vector<8x128xi32>
    %cst_17 = arith.constant 0xFF800000 : f32
    %26 = vector.broadcast %cst_17 : f32 to vector<8x128xf32>
    %27 = arith.select %25, %22, %26 : vector<8x128xi1>, vector<8x128xf32>
    %cst_18 = arith.constant dense<0xFF800000> : vector<8xf32>
    %28 = vector.multi_reduction <maximumf>, %27, %cst_18 [1] : vector<8x128xf32> to vector<8xf32>
    %29 = vector.shape_cast %28 : vector<8xf32> to vector<8x1xf32>
    %30 = vector.broadcast %29 : vector<8x1xf32> to vector<8x128xf32>
    %31 = arith.subf %27, %30 : vector<8x128xf32>
    %32 = math.exp %31 : vector<8x128xf32>
    %cst_19 = arith.constant dense<0.000000e+00> : vector<8xf32>
    %33 = vector.multi_reduction <add>, %32, %cst_19 [1] : vector<8x128xf32> to vector<8xf32>
    %34 = vector.shape_cast %33 : vector<8xf32> to vector<8x1xf32>
    %35 = math.log %34 : vector<8x1xf32>
    %36 = arith.addf %35, %29 : vector<8x1xf32>
    %37 = vector.broadcast %36 : vector<8x1xf32> to vector<8x128xf32>
    %38 = arith.subf %22, %37 : vector<8x128xf32>
    %cst_20 = arith.constant 0.000000e+00 : f32
    %39 = vector.broadcast %cst_20 : f32 to vector<8x128xf32>
    %40 = arith.select %25, %38, %39 : vector<8x128xi1>, vector<8x128xf32>
    %c0_21 = arith.constant 0 : index
    %c0_22 = arith.constant 0 : index
    %41 = vector.load %arg8[%c0_21, %c0_22] : memref<8x128xf32, #tpu.memory_space<vmem>>, vector<8x128xf32>
    tpu.vector_store %arg8[%c0_21, %c0_22], %40 {strides = array<i32>} : memref<8x128xf32, #tpu.memory_space<vmem>>, vector<8x128xf32>,
    return
  }
  func.func @transform_0(%arg0: i32) -> (i32, i32) {
    %c0_i32 = arith.constant 0 : i32
    %c0_i32_0 = arith.constant 0 : i32
    return %arg0, %c0_i32 : i32, i32
  }
  func.func @transform_1(%arg0: i32) -> (i32, i32) {
    %c0_i32 = arith.constant 0 : i32
    %c0_i32_0 = arith.constant 0 : i32
    %c0_i32_1 = arith.constant 0 : i32
    return %c0_i32, %c0_i32_0 : i32, i32
  }
  func.func @transform_2(%arg0: i32) -> (i32, i32) {
    %c0_i32 = arith.constant 0 : i32
    %c0_i32_0 = arith.constant 0 : i32
    %c0_i32_1 = arith.constant 0 : i32
    return %c0_i32, %c0_i32_0 : i32, i32
  }
  func.func @transform_3(%arg0: i32) -> (i32, i32) {
    %c0_i32 = arith.constant 0 : i32
    %c0_i32_0 = arith.constant 0 : i32
    %c0_i32_1 = arith.constant 0 : i32
    return %c0_i32, %c0_i32_0 : i32, i32
  }
  func.func @transform_4(%arg0: i32) -> (i32, i32) {
    %c0_i32 = arith.constant 0 : i32
    %c0_i32_0 = arith.constant 0 : i32
    %c0_i32_1 = arith.constant 0 : i32
    return %c0_i32, %c0_i32_0 : i32, i32
  }
  func.func @transform_5(%arg0: i32) -> (i32, i32) {
    %c0_i32 = arith.constant 0 : i32
    %c0_i32_0 = arith.constant 0 : i32
    %c0_i32_1 = arith.constant 0 : i32
    return %c0_i32, %c0_i32_0 : i32, i32
  }
  func.func @transform_6(%arg0: i32) -> (i32, i32) {
    %c0_i32 = arith.constant 0 : i32
    %c0_i32_0 = arith.constant 0 : i32
    %c0_i32_1 = arith.constant 0 : i32
    return %c0_i32, %c0_i32_0 : i32, i32
  }
  func.func @transform_7(%arg0: i32) -> (i32, i32) {
    %c0_i32 = arith.constant 0 : i32
    %c0_i32_0 = arith.constant 0 : i32
    return %arg0, %c0_i32 : i32, i32
  }
}

</mosaic_0001>

<bundles_post_ra>
// kernel: forward.1
= control target key start
LH: loop header
LB: loop body
LE: loop exit
PB: predicated region body
PF: predicated region fallthrough
CT: control target
= control target key end

     0   :  { %12 = vsyncpa [#allocation3], 0  ;;  %s1324_s24 = smov [#allocation2]   ;;  %s1476_s0 = inlined_call_operand.vmem [shape: f32[8,1024], index: 0, kind: input, shape index: {}]   ;;  %s1477_s1 = inlined_call_operand.hbm [shape: bf16[1024,128], index: 1, kind: input, shape index: {}]   ;;  %s1478_s2 = inlined_call_operand.vmem [shape: f32[1,128], index: 2, kind: input, shape index: {}]   ;;  %s1479_s3 = inlined_call_operand.vmem [shape: bf16[128,128], index: 3, kind: input, shape index: {}]   ;;  %s1480_s4 = inlined_call_operand.vmem [shape: f32[1,128], index: 4, kind: input, shape index: {}]   ;;  %s1481_s5 = inlined_call_operand.vmem [shape: bf16[128,128], index: 5, kind: input, shape index: {}]   ;;  %s1482_s6 = inlined_call_operand.vmem [shape: f32[1,128], index: 6, kind: input, shape index: {}]   ;;  %s1483_s7 = inlined_call_operand.vmem [shape: f32[8,128], index: 7, kind: output, shape index: {}]  }
   0x1   :  { %s20_s25 = sshll.u32 %s1324_s24, 4  ;;  %s21_s25 = int_to_ptr.vmem [resolvable:$true] %s20_s25 }
   0x2   :  { %s1310_s26 = scalar_lea.vmem %s21_s25, 8192  ;;  %p1315_p1 = scmp.lt.s32.totalorder %s21_s25, %s21_s25 }
   0x3   :  { %p1311_p0 = scmp.ne.s32.totalorder %s21_s25, %s1310_s26  ;;  %p1316_p2 = scmp.lt.s32.totalorder %s1310_s26, %s1310_s26 }
   0x5   :  { %p1317_p3 = por %p1316_p2, %p1315_p1 }
   0x7   :  { %p1318_p4 = pnand %p1317_p3, %p1311_p0 }
   0x9   :  { %1321 = shalt.err (!%p1318_p4)
}
   0xa   :  { %s1325_s27 = smov 64   ;;  %s1326_s28 = smov 4  }
   0xb   :  { %26 = dma.hbm_to_vmem [thread:$0]  %s1477_s1, 8192, %s21_s25, [#allocation3], %s1325_s27, %s1325_s27, %s1326_s28  }
   0xc   :  { %1322 = dma.done.wait [#allocation3], 8192  }
   0xd   :  { %1323 = vsyncadd [#allocation3], 4294959104  ;;  %v1218_v0 = vld [vmem:[#allocation2 + $0x78] sm:$0xff]   ;;  %v1222_v4 = vld [vmem:[#allocation2 + $0x70] sm:$0xff]   ;;  %vm1328_vm0 = vmmov 0  }
   0xe   :  { %v1219_v1 = vld [vmem:[#allocation2 + $0xf8] sm:$0xff]   ;;  %1067 = vmatprep.subr.bf16.mxu0 %v1218_v0  ;;  %v1223_v5 = vld [vmem:[#allocation2 + $0xf0] sm:$0xff]   ;;  %v1226_v8 = vld [vmem:[#allocation2 + $0x68] sm:$0xff]  }
   0xf   :  { %v1220_v2 = vld [vmem:[#allocation2 + $0x38] sm:$0xff]   ;;  %1089 = vmatprep.subr.bf16.mxu1 %v1219_v1  ;;  %v1224_v6 = vld [vmem:[#allocation2 + $0x30] sm:$0xff]   ;;  %v1227_v9 = vld [vmem:[#allocation2 + $0xe8] sm:$0xff]  }
  0x10   :  { %v1221_v3 = vld [vmem:[#allocation2 + $0xb8] sm:$0xff]   ;;  %1068 = vmatpush3.bf16.msra.mxu0 %v1220_v2  ;;  %v1225_v7 = vld [vmem:[#allocation2 + $0xb0] sm:$0xff]   ;;  %v1228_v10 = vld [vmem:[#allocation2 + $0x28] sm:$0xff]  }
  0x11   :  { %1090 = vmatpush3.bf16.msra.mxu1 %v1221_v3  ;;  %1069 = vmatprep.subr.bf16.mxu0 %v1222_v4  ;;  %v1229_v11 = vld [vmem:[#allocation2 + $0xa8] sm:$0xff]   ;;  %v1230_v12 = vld [vmem:[#allocation2 + $0x60] sm:$0xff]   ;;  %v1234_v16 = vld [vmem:[#allocation2 + $0x58] sm:$0xff]  }
  0x12   :  { %1091 = vmatprep.subr.bf16.mxu1 %v1223_v5  ;;  %v1231_v13 = vld [vmem:[#allocation2 + $0xe0] sm:$0xff]   ;;  %v1235_v17 = vld [vmem:[#allocation2 + $0xd8] sm:$0xff]   ;;  %v1238_v20 = vld [vmem:[#allocation2 + $0x50] sm:$0xff]  }
  0x13   :  { %v1232_v14 = vld [vmem:[#allocation2 + $0x20] sm:$0xff]   ;;  %v1236_v18 = vld [vmem:[#allocation2 + $0x18] sm:$0xff]   ;;  %v1239_v21 = vld [vmem:[#allocation2 + $0xd0] sm:$0xff]  }
  0x14   :  { %1070 = vmatpush3.bf16.msra.mxu0 %v1224_v6  ;;  %v1233_v15 = vld [vmem:[#allocation2 + $0xa0] sm:$0xff]   ;;  %v1237_v19 = vld [vmem:[#allocation2 + $0x98] sm:$0xff]   ;;  %v1240_v22 = vld [vmem:[#allocation2 + $0x10] sm:$0xff]  }
  0x15   :  { %1092 = vmatpush3.bf16.msra.mxu1 %v1225_v7  ;;  %1071 = vmatprep.subr.bf16.mxu0 %v1226_v8  ;;  %v1241_v23 = vld [vmem:[#allocation2 + $0x90] sm:$0xff]   ;;  %v1242_v24 = vld [vmem:[#allocation2 + $0x48] sm:$0xff]   ;;  %v1246_v28 = vld [vmem:[#allocation2 + $0x40] sm:$0xff]  }
  0x16   :  { %1093 = vmatprep.subr.bf16.mxu1 %v1227_v9  ;;  %v1243_v25 = vld [vmem:[#allocation2 + $0xc8] sm:$0xff]   ;;  %v1247_v29 = vld [vmem:[#allocation2 + $0xc0] sm:$0xff]   ;;  %v44_v33 = vld [vmem:[%s1476_s0 + $0x18] sm:$0xff] }
  0x17   :  { %v1244_v26 = vld [vmem:[#allocation2 + $0x8] sm:$0xff]   ;;  %v1248_v30 = vld [vmem:[#allocation2] sm:$0xff]   ;;  %v181_v36 = vpack.c.bf16 %v44_v33, %v44_v33  ;;  %v43_v38 = vld [vmem:[%s1476_s0 + $0x10] sm:$0xff] }
  0x18   :  { %1072 = vmatpush3.bf16.msra.mxu0 %v1228_v10  ;;  %v1245_v27 = vld [vmem:[#allocation2 + $0x88] sm:$0xff]   ;;  %v1249_v31 = vld [vmem:[#allocation2 + $0x80] sm:$0xff]   ;;  %v180_v39 = vpack.c.bf16 %v43_v38, %v43_v38  ;;  %v1250_v40 = vld [vmem:[#allocation2 + $0x178] sm:$0xff]  }
  0x19   :  { %1094 = vmatpush3.bf16.msra.mxu1 %v1229_v11  ;;  %1073 = vmatprep.subr.bf16.mxu0 %v1230_v12  ;;  %v42_v32 = vld [vmem:[%s1476_s0 + $0x8] sm:$0xff]  ;;  %v41_v34 = vld [vmem:[%s1476_s0] sm:$0xff]  ;;  %v1251_v41 = vld [vmem:[#allocation2 + $0x1f8] sm:$0xff]  }
  0x1a   :  { %1095 = vmatprep.subr.bf16.mxu1 %v1231_v13  ;;  %v179_v35 = vpack.c.bf16 %v42_v32, %v42_v32  ;;  %v178_v37 = vpack.c.bf16 %v41_v34, %v41_v34  ;;  %648 = vmatprep.mubr.bf16.mxu1 %v181_v36  ;;  %v1252_v42 = vld [vmem:[#allocation2 + $0x138] sm:$0xff]   ;;  %v1254_v44 = vld [vmem:[#allocation2 + $0x170] sm:$0xff]   ;;  %v1258_v48 = vld [vmem:[#allocation2 + $0x168] sm:$0xff]  }
  0x1b   :  { %v1253_v43 = vld [vmem:[#allocation2 + $0x1b8] sm:$0xff]   ;;  %v1255_v45 = vld [vmem:[#allocation2 + $0x1f0] sm:$0xff]   ;;  %v1259_v49 = vld [vmem:[#allocation2 + $0x1e8] sm:$0xff]  }
  0x1c   :  { %1074 = vmatpush3.bf16.msra.mxu0 %v1232_v14  ;;  %608 = vmatprep.mubr.bf16.mxu0 %v179_v35  ;;  %v1256_v46 = vld [vmem:[#allocation2 + $0x130] sm:$0xff]   ;;  %v1260_v50 = vld [vmem:[#allocation2 + $0x128] sm:$0xff]   ;;  %v1262_v52 = vld [vmem:[#allocation2 + $0x160] sm:$0xff]  }
  0x1d   :  { %1096 = vmatpush3.bf16.msra.mxu1 %v1233_v15  ;;  %1075 = vmatprep.subr.bf16.mxu0 %v1234_v16  ;;  %v1257_v47 = vld [vmem:[#allocation2 + $0x1b0] sm:$0xff]   ;;  %v1261_v51 = vld [vmem:[#allocation2 + $0x1a8] sm:$0xff]   ;;  %v1263_v53 = vld [vmem:[#allocation2 + $0x1e0] sm:$0xff]  }
  0x1e   :  { %1097 = vmatprep.subr.bf16.mxu1 %v1235_v17  ;;  %v1264_v54 = vld [vmem:[#allocation2 + $0x120] sm:$0xff]   ;;  %v1266_v56 = vld [vmem:[#allocation2 + $0x158] sm:$0xff]   ;;  %v1270_v60 = vld [vmem:[#allocation2 + $0x150] sm:$0xff]   ;;  %v1327_v17 = vmov 0.0  }
  0x1f   :  { %v1265_v55 = vld [vmem:[#allocation2 + $0x1a0] sm:$0xff]   ;;  %v1267_v57 = vld [vmem:[#allocation2 + $0x1d8] sm:$0xff]   ;;  %v1271_v61 = vld [vmem:[#allocation2 + $0x1d0] sm:$0xff]  }
  0x20   :  { %1076 = vmatpush3.bf16.msra.mxu0 %v1236_v18  ;;  %v1268_v58 = vld [vmem:[#allocation2 + $0x118] sm:$0xff]   ;;  %v1272_v62 = vld [vmem:[#allocation2 + $0x110] sm:$0xff]   ;;  %v1274_v0 = vld [vmem:[#allocation2 + $0x148] sm:$0xff]  }
  0x21   :  { %1098 = vmatpush3.bf16.msra.mxu1 %v1237_v19  ;;  %1077 = vmatprep.subr.bf16.mxu0 %v1238_v20  ;;  %v1269_v59 = vld [vmem:[#allocation2 + $0x198] sm:$0xff]   ;;  %v1273_v63 = vld [vmem:[#allocation2 + $0x190] sm:$0xff]   ;;  %v1275_v1 = vld [vmem:[#allocation2 + $0x1c8] sm:$0xff]  }
  0x22   :  { %1099 = vmatprep.subr.bf16.mxu1 %v1239_v21  ;;  %v1276_v2 = vld [vmem:[#allocation2 + $0x108] sm:$0xff]   ;;  %v1278_v4 = vld [vmem:[#allocation2 + $0x140] sm:$0xff]   ;;  %v48_v9 = vld [vmem:[%s1476_s0 + $0x38] sm:$0xff] }
  0x23   :  { %v1277_v3 = vld [vmem:[#allocation2 + $0x188] sm:$0xff]   ;;  %v1279_v5 = vld [vmem:[#allocation2 + $0x1c0] sm:$0xff]   ;;  %v185_v11 = vpack.c.bf16 %v48_v9, %v48_v9  ;;  %v47_v13 = vld [vmem:[%s1476_s0 + $0x30] sm:$0xff] }
  0x24   :  { %1078 = vmatpush3.bf16.msra.mxu0 %v1240_v22  ;;  %v1280_v6 = vld [vmem:[#allocation2 + $0x100] sm:$0xff]   ;;  %v46_v8 = vld [vmem:[%s1476_s0 + $0x28] sm:$0xff]  ;;  %v184_v15 = vpack.c.bf16 %v47_v13, %v47_v13  ;;  %v1282_v16 = vld [vmem:[%s1479_s3 + $0x38] sm:$0xff]  }
  0x25   :  { %1100 = vmatpush3.bf16.msra.mxu1 %v1241_v23  ;;  %1079 = vmatprep.subr.bf16.mxu0 %v1242_v24  ;;  %v1281_v7 = vld [vmem:[#allocation2 + $0x180] sm:$0xff]   ;;  %v183_v10 = vpack.c.bf16 %v46_v8, %v46_v8  ;;  %v1283_v18 = vld [vmem:[%s1479_s3 + $0x30] sm:$0xff]   ;;  %v1284_v19 = vld [vmem:[%s1479_s3 + $0x28] sm:$0xff]  }
  0x26   :  { %1101 = vmatprep.subr.bf16.mxu1 %v1243_v25  ;;  %v45_v12 = vld [vmem:[%s1476_s0 + $0x20] sm:$0xff]  ;;  %v1286_v21 = vld [vmem:[%s1479_s3 + $0x18] sm:$0xff]   ;;  %v1287_v22 = vld [vmem:[%s1479_s3 + $0x10] sm:$0xff]  }
  0x27   :  { %v182_v14 = vpack.c.bf16 %v45_v12, %v45_v12  ;;  %v1285_v20 = vld [vmem:[%s1479_s3 + $0x20] sm:$0xff]   ;;  %v1288_v23 = vld [vmem:[%s1479_s3 + $0x8] sm:$0xff]   ;;  %v1290_v25 = vld [vmem:[%s1481_s5 + $0x38] sm:$0xff]  }
  0x28   :  { %1080 = vmatpush3.bf16.msra.mxu0 %v1244_v26  ;;  %v1289_v24 = vld [vmem:[%s1479_s3] sm:$0xff]   ;;  %v1291_v26 = vld [vmem:[%s1481_s5 + $0x30] sm:$0xff]  }
  0x29   :  { %1102 = vmatpush3.bf16.msra.mxu1 %v1245_v27  ;;  %1081 = vmatprep.subr.bf16.mxu0 %v1246_v28  ;;  %v1292_v27 = vld [vmem:[%s1481_s5 + $0x28] sm:$0xff]   ;;  %v1293_v28 = vld [vmem:[%s1481_s5 + $0x20] sm:$0xff]  }
  0x2a   :  { %1103 = vmatprep.subr.bf16.mxu1 %v1247_v29  ;;  %v1294_v29 = vld [vmem:[%s1481_s5 + $0x18] sm:$0xff]  }
  0x2c   :  { %1082 = vmatpush3.bf16.msra.mxu0 %v1248_v30  ;;  %v1295_v30 = vld [vmem:[%s1481_s5 + $0x10] sm:$0xff]  }
  0x2d   :  { %1104 = vmatpush3.bf16.msra.mxu1 %v1249_v31  ;;  %1111 = vmatprep.subr.bf16.mxu0 %v1250_v40  ;;  %v984_v40 = vld [vmem:[%s1478_s2] ss:$0 sm:$0xff] }
  0x2e   :  { %1133 = vmatprep.subr.bf16.mxu1 %v1251_v41 }
  0x2f   :  { %609 = vmatmul.mubr.bf16.vlgmr.msra.gmra.mxu0 %v178_v37 }
  0x30   :  { %649 = vmatmul.mubr.bf16.vlgmr.msra.gmra.mxu1 %v180_v39  ;;  %1112 = vmatpush3.bf16.msra.mxu0 %v1252_v42 }
  0x31   :  { %1134 = vmatpush3.bf16.msra.mxu1 %v1253_v43  ;;  %1113 = vmatprep.subr.bf16.mxu0 %v1254_v44 }
  0x32   :  { %1135 = vmatprep.subr.bf16.mxu1 %v1255_v45  ;;  %688 = vmatprep.mubr.bf16.mxu0 %v183_v10 }
  0x33   :  { %728 = vmatprep.mubr.bf16.mxu1 %v185_v11 }
  0x34   :  { %1114 = vmatpush3.bf16.msra.mxu0 %v1256_v46 }
  0x35   :  { %1136 = vmatpush3.bf16.msra.mxu1 %v1257_v47  ;;  %1115 = vmatprep.subr.bf16.mxu0 %v1258_v48 }
  0x36   :  { %1137 = vmatprep.subr.bf16.mxu1 %v1259_v49 }
  0x38   :  { %1116 = vmatpush3.bf16.msra.mxu0 %v1260_v50 }
  0x39   :  { %1138 = vmatpush3.bf16.msra.mxu1 %v1261_v51  ;;  %1117 = vmatprep.subr.bf16.mxu0 %v1262_v52 }
  0x3a   :  { %1139 = vmatprep.subr.bf16.mxu1 %v1263_v53 }
  0x3c   :  { %1118 = vmatpush3.bf16.msra.mxu0 %v1264_v54 }
  0x3d   :  { %1140 = vmatpush3.bf16.msra.mxu1 %v1265_v55  ;;  %1119 = vmatprep.subr.bf16.mxu0 %v1266_v56 }
  0x3e   :  { %1141 = vmatprep.subr.bf16.mxu1 %v1267_v57 }
  0x40   :  { %1120 = vmatpush3.bf16.msra.mxu0 %v1268_v58  ;;  %v1296_v58 = vld [vmem:[%s1481_s5 + $0x8] sm:$0xff]  }
  0x41   :  { %1142 = vmatpush3.bf16.msra.mxu1 %v1269_v59  ;;  %1121 = vmatprep.subr.bf16.mxu0 %v1270_v60  ;;  %v1297_v59 = vld [vmem:[%s1481_s5] sm:$0xff]  }
  0x42   :  { %1143 = vmatprep.subr.bf16.mxu1 %v1271_v61  ;;  %v1049_v60 = vld [vmem:[%s1480_s4] ss:$0 sm:$0xff] }
  0x44   :  { %1122 = vmatpush3.bf16.msra.mxu0 %v1272_v62 }
  0x45   :  { %1144 = vmatpush3.bf16.msra.mxu1 %v1273_v63  ;;  %1123 = vmatprep.subr.bf16.mxu0 %v1274_v0 }
  0x46   :  { %1145 = vmatprep.subr.bf16.mxu1 %v1275_v1 }
  0x48   :  { %1124 = vmatpush3.bf16.msra.mxu0 %v1276_v2 }
  0x49   :  { %1146 = vmatpush3.bf16.msra.mxu1 %v1277_v3  ;;  %1125 = vmatprep.subr.bf16.mxu0 %v1278_v4  ;;  %v962_v4 = vlaneseq }
  0x4a   :  { %1147 = vmatprep.subr.bf16.mxu1 %v1279_v5 }
  0x4b   :  { %v963_v5 = vand.u32 127, %v962_v4 }
  0x4c   :  { %1126 = vmatpush3.bf16.msra.mxu0 %v1280_v6  ;;  %v1058_v6 = vld [vmem:[%s1482_s6] ss:$0 sm:$0xff] }
  0x4d   :  { %1148 = vmatpush3.bf16.msra.mxu1 %v1281_v7  ;;  %1173 = vmatprep.subr.bf16.mxu0 %v1327_v17  ;;  %vm964_vm1 = vcmp.lt.s32.totalorder %v963_v5, 10 }
  0x4e   :  { %1193 = vmatprep.subr.bf16.mxu1 %v1327_v17 }
  0x4f   :  { %689 = vmatmul.mubr.bf16.vlgmr.msra.gmra.mxu0 %v182_v14 }
  0x50   :  { %729 = vmatmul.mubr.bf16.vlgmr.msra.gmra.mxu1 %v184_v15  ;;  %1174 = vmatpush3.bf16.msra.mxu0 %v1282_v16 }
  0x51   :  { %1175 = vmatprep.subr.bf16.mxu0 %v1327_v17  ;;  %1189 = vmatprep.mubr.msk.bf16.mxu0 %vm1328_vm0, %v1327_v17 }
  0x52   :  { %1209 = vmatprep.mubr.msk.bf16.mxu1 %vm1328_vm0, %v1327_v17  ;;  %1194 = vmatpush3.bf16.msra.mxu1 %v1290_v25 }
  0x53   :  { %1195 = vmatprep.subr.bf16.mxu1 %v1327_v17 }
  0x54   :  { %1176 = vmatpush3.bf16.msra.mxu0 %v1283_v18 }
  0x55   :  { %1177 = vmatprep.subr.bf16.mxu0 %v1327_v17 }
  0x56   :  { %1196 = vmatpush3.bf16.msra.mxu1 %v1291_v26 }
  0x57   :  { %1197 = vmatprep.subr.bf16.mxu1 %v1327_v17 }
  0x58   :  { %1178 = vmatpush3.bf16.msra.mxu0 %v1284_v19 }
  0x59   :  { %1179 = vmatprep.subr.bf16.mxu0 %v1327_v17 }
  0x5a   :  { %1198 = vmatpush3.bf16.msra.mxu1 %v1292_v27 }
  0x5b   :  { %1199 = vmatprep.subr.bf16.mxu1 %v1327_v17 }
  0x5c   :  { %1180 = vmatpush3.bf16.msra.mxu0 %v1285_v20 }
  0x5d   :  { %1181 = vmatprep.subr.bf16.mxu0 %v1327_v17 }
  0x5e   :  { %1200 = vmatpush3.bf16.msra.mxu1 %v1293_v28 }
  0x5f   :  { %1201 = vmatprep.subr.bf16.mxu1 %v1327_v17 }
  0x60   :  { %1182 = vmatpush3.bf16.msra.mxu0 %v1286_v21 }
  0x61   :  { %1183 = vmatprep.subr.bf16.mxu0 %v1327_v17 }
  0x62   :  { %1202 = vmatpush3.bf16.msra.mxu1 %v1294_v29 }
  0x63   :  { %1203 = vmatprep.subr.bf16.mxu1 %v1327_v17 }
  0x64   :  { %1184 = vmatpush3.bf16.msra.mxu0 %v1287_v22 }
  0x65   :  { %1185 = vmatprep.subr.bf16.mxu0 %v1327_v17 }
  0x66   :  { %1204 = vmatpush3.bf16.msra.mxu1 %v1295_v30 }
  0x67   :  { %1205 = vmatprep.subr.bf16.mxu1 %v1327_v17 }
  0x68   :  { %1186 = vmatpush3.bf16.msra.mxu0 %v1288_v23 }
  0x69   :  { %1187 = vmatprep.subr.bf16.mxu0 %v1327_v17 }
  0x6a   :  { %1206 = vmatpush3.bf16.msra.mxu1 %v1296_v58 }
  0x6b   :  { %1207 = vmatprep.subr.bf16.mxu1 %v1327_v17 }
  0x6c   :  { %1188 = vmatpush3.bf16.msra.mxu0 %v1289_v24 }
  0x6e   :  { %1208 = vmatpush3.bf16.msra.mxu1 %v1297_v59 }
  0xef   :  { %v1083_v31 = vpop.f32.mrf.mxu0 }
  0xf0   :  { %v1105_v32 = vpop.f32.mrf.mxu1 }
  0xf1   :  { %v1084_v33 = vpop.f32.mrf.mxu0 }
  0xf2   :  { %v1106_v34 = vpop.f32.mrf.mxu1  ;;  %v1085_v39 = vadd.f32 %v1084_v33, %v1083_v31 }
  0xf3   :  { %v1086_v35 = vpop.f32.mrf.mxu0  ;;  %v1107_v42 = vadd.f32 %v1106_v34, %v1105_v32 }
  0xf4   :  { %v1108_v36 = vpop.f32.mrf.mxu1  ;;  %v611_v41 = vadd.f32 %v1085_v39, %v984_v40 }
  0xf5   :  { %v1087_v37 = vpop.f32.mrf.mxu0 }
  0xf6   :  { %v1109_v38 = vpop.f32.mrf.mxu1  ;;  %v651_v46 = vadd.f32 %v1107_v42, %v611_v41 }
 0x10f   :  { %v1127_v43 = vpop.f32.mrf.mxu0 }
 0x110   :  { %v1149_v44 = vpop.f32.mrf.mxu1 }
 0x111   :  { %v1128_v45 = vpop.f32.mrf.mxu0 }
 0x112   :  { %v1129_v47 = vadd.f32 %v1128_v45, %v1127_v43  ;;  %v1150_v48 = vpop.f32.mrf.mxu1 }
 0x113   :  { %v1130_v49 = vpop.f32.mrf.mxu0  ;;  %v1151_v51 = vadd.f32 %v1150_v48, %v1149_v44 }
 0x114   :  { %v691_v50 = vadd.f32 %v1129_v47, %v651_v46  ;;  %v1152_v52 = vpop.f32.mrf.mxu1 }
 0x115   :  { %v1131_v53 = vpop.f32.mrf.mxu0 }
 0x116   :  { %v731_v54 = vadd.f32 %v1151_v51, %v691_v50  ;;  %v1153_v55 = vpop.f32.mrf.mxu1 }
 0x118   :  { %v736_v56 = vmax.f32 %v731_v54, 0.0 }
 0x11a   :  { %v754_v57 = vpack.c.bf16 %v736_v56, %v736_v56 }
 0x11c   :  { %1190 = vmatmul.mubr.bf16.vlgmr.msra.gmra.mxu0 %v754_v57 }
 0x1dc   :  { %v843_v61 = vpop.f32.mrf.mxu0 }
 0x1dd   :  { %v844_v62 = vadd.f32 %v1049_v60, %v843_v61 }
 0x1de   :  { %v1191_v63 = vpop.f32.mrf.mxu0 }
 0x1df   :  { %v849_v0 = vmax.f32 %v844_v62, 0.0 }
 0x1e0   :  { %v846_v1 = vpop.f32.mrf.mxu0 }
 0x1e1   :  { %v867_v2 = vpack.c.bf16 %v849_v0, %v849_v0 }
 0x1e2   :  { %v1192_v3 = vpop.f32.mrf.mxu0 }
 0x1e3   :  { %1210 = vmatmul.mubr.bf16.vlgmr.msra.gmra.mxu1 %v867_v2 }
 0x2a3   :  { %v956_v7 = vpop.f32.mrf.mxu1 }
 0x2a4   :  { %v957_v8 = vadd.f32 %v1058_v6, %v956_v7 }
 0x2a5   :  { %v1211_v9 = vpop.f32.mrf.mxu1 }
 0x2a6   :  { %v965_v10 = vsel %vm964_vm1, %v957_v8, -inf }
 0x2a7   :  { %966 = vmax.xlane.f32.xlu0 %v965_v10  ;;  %v959_v11 = vpop.f32.mrf.mxu1 }
 0x2a9   :  { %v1212_v12 = vpop.f32.mrf.mxu1 }
 0x330   :  { %v967_v13 = vpop.xlane.xlu0 %966 }
 0x331   :  { %v968_v14 = vsub.f32 %v965_v10, %v967_v13 }
 0x333   :  { %v969_v15 = vmul.f32 1.442695, %v968_v14 }
 0x335   :  { %1298 = vpow2.f32 %v969_v15 }
 0x342   :  { %v1299_v16 = vpop.eup %1298 }
 0x343   :  { %971 = vadd.xlane.f32.xlu0 %v1299_v16 }
 0x3cc   :  { %v972_v17 = vpop.xlane.xlu0 %971 }
 0x3cd   :  { %1300 = vlog2.f32 %v972_v17 }
 0x3da   :  { %v1301_v18 = vpop.eup %1300 }
 0x3db   :  { %v974_v19 = vmul.f32 0.6931472, %v1301_v18 }
 0x3dd   :  { %v975_v20 = vadd.f32 %v974_v19, %v967_v13 }
 0x3df   :  { %v976_v21 = vsub.f32 %v957_v8, %v975_v20 }
 0x3e1   :  { %v977_v22 = vsel %vm964_vm1, %v976_v21, 0.0 }
 0x3e2   :  { %978 = vst [vmem:[%s1483_s7] sm:$0xff] %v977_v22 }
 0x3e3   :  { %983 = vsyncpa [#allocation3], 1 }

</bundles_post_ra>
